<compile_context>
chip_gen: v6e
topology: v6e:2x2x1
jax: 0.10.0
libtpu: 0.0.40
codegen_flags: <defaults>
</compile_context>

<pallas_src>
import functools

import numpy as np
import jax
import jax.numpy as jnp
from jax import lax
from jax.experimental import pallas as pl
from jax.experimental.pallas import tpu as pltpu


# ----------------------------------------------------------------------------
# Host-side (glue): triangular window + modulation construction (static, done
# once in the module's __init__ in the PyTorch original).
# ----------------------------------------------------------------------------
def triang(M: int) -> np.ndarray:
    """scipy.signal.windows.triang(M), reimplemented in numpy (deterministic)."""
    if M <= 0:
        return np.zeros((0,), dtype=np.float64)
    if M == 1:
        return np.ones((1,), dtype=np.float64)
    if M % 2 == 0:
        n = np.arange(1, M // 2 + 1, dtype=np.float64)
        w = (2.0 * n - 1.0) / M
        return np.concatenate([w, w[::-1]])
    else:
        n = np.arange(1, (M + 1) // 2 + 1, dtype=np.float64)
        w = 2.0 * n / (M + 1)
        return np.concatenate([w, w[-2::-1]])


def construct_modulation(data_axis: np.ndarray, window_center: float,
                         window_size: float, amplitude: float) -> np.ndarray:
    data_axis = np.asarray(data_axis, dtype=np.float32)
    window = np.ones_like(data_axis)
    mask = np.abs(data_axis - window_center) < window_size
    mod_len = int(np.sum(mask))
    mod_window = 1.0 - triang(mod_len) * amplitude
    window[mask] = mod_window.astype(window.dtype)
    return window  # (L,), float32


# ----------------------------------------------------------------------------
# Pass 1: tiled global min/max reduction.
# ----------------------------------------------------------------------------
def _minmax_kernel(sig_ref, min_ref, max_ref, *, B, L, TB, TL):
    i = pl.program_id(0)
    j = pl.program_id(1)

    @pl.when((i == 0) & (j == 0))
    def _():
        min_ref[...] = jnp.full((1, 1), jnp.inf, jnp.float32)
        max_ref[...] = jnp.full((1, 1), -jnp.inf, jnp.float32)

    sig = sig_ref[...]                                          # (TB, TL) f32
    row = i * TB + lax.broadcasted_iota(jnp.int32, (TB, TL), 0)
    col = j * TL + lax.broadcasted_iota(jnp.int32, (TB, TL), 1)
    valid = (row < B) & (col < L)                               # mask padded edge tiles
    tmin = jnp.min(jnp.where(valid, sig, jnp.inf), keepdims=True)    # (1,1)
    tmax = jnp.max(jnp.where(valid, sig, -jnp.inf), keepdims=True)   # (1,1)
    min_ref[...] = jnp.minimum(min_ref[...], tmin)
    max_ref[...] = jnp.maximum(max_ref[...], tmax)


# ----------------------------------------------------------------------------
# Pass 2: lane-dense elementwise add of the pre-scaled spike row.
# ----------------------------------------------------------------------------
def _apply_kernel(sig_ref, spike_ref, out_ref):
    # Fused math: ((sig-mn)/rng + (1-mod))*rng + mn == sig + (1-mod)*rng,
    # with (1-mod)*rng precomputed once per call in the wrapper.
    out_ref[...] = sig_ref[...] + spike_ref[...]    # (TB,TL) + (1,TL) broadcast


_VMEM_LIMIT = 32 * 1024 * 1024  # safe headroom on v5e/v6e (128 MiB) and v7x (64 MiB)


def _tile_sizes(B, L):
    TB = B if B <= 256 else 256       # 256 % 8 == 0; otherwise full dim -> legal block
    TL = L if L <= 2048 else 2048     # 2048 % 128 == 0; otherwise full dim -> legal block
    return TB, TL


def add_spike(signal: jax.Array, modulation: jax.Array) -> jax.Array:
    """signal: (B, L), modulation: (L,)  ->  (L, B) float32 (matches PyTorch forward)."""
    signal = signal.astype(jnp.float32)
    modulation = modulation.astype(jnp.float32)
    B, L = signal.shape
    TB, TL = _tile_sizes(B, L)
    grid = (pl.cdiv(B, TB), pl.cdiv(L, TL))

    # ---- pass 1: global min/max (accumulators stay resident across the grid) ----
    mn, mx = pl.pallas_call(
        functools.partial(_minmax_kernel, B=B, L=L, TB=TB, TL=TL),
        out_shape=(jax.ShapeDtypeStruct((1, 1), jnp.float32),
                   jax.ShapeDtypeStruct((1, 1), jnp.float32)),
        grid=grid,
        in_specs=[pl.BlockSpec((TB, TL), lambda i, j: (i, j))],
        out_specs=(pl.BlockSpec((1, 1), lambda i, j: (0, 0)),
                   pl.BlockSpec((1, 1), lambda i, j: (0, 0))),
        compiler_params=pltpu.CompilerParams(
            dimension_semantics=("arbitrary", "arbitrary"),
            vmem_limit_bytes=_VMEM_LIMIT),
    )(signal)

    # Hoisted once per call (L elements, done by XLA): (1 - mod) * (mx - mn).
    spike_row = (1.0 - modulation)[None, :] * (mx - mn)          # (1, L) f32

    # ---- pass 2: lane-dense elementwise add; output stays (B, L) ----
    # TODO(synk): add input_output_aliases={0: 0} when callers donate `signal`.
    out_bl = pl.pallas_call(
        _apply_kernel,
        out_shape=jax.ShapeDtypeStruct((B, L), jnp.float32),
        grid=grid,
        in_specs=[pl.BlockSpec((TB, TL), lambda i, j: (i, j)),
                  pl.BlockSpec((1, TL), lambda i, j: (0, j))],
        out_specs=pl.BlockSpec((TB, TL), lambda i, j: (i, j)),
        compiler_params=pltpu.CompilerParams(
            dimension_semantics=("parallel", "parallel"),
            vmem_limit_bytes=_VMEM_LIMIT),
    )(signal, spike_row)

    # Module forward returns mod_signal.t(); transpose outside the kernel so the
    # kernel's stores stay lane-dense (consume (B, L) directly downstream if possible).
    return out_bl.T


# ----------------------------------------------------------------------------
# Pure-JAX reference (faithful mirror of PyTorch apply_modulation).
# ----------------------------------------------------------------------------
def add_spike_ref(signal, modulation):
    mn = jnp.min(signal)
    mx = jnp.max(signal)
    s = (signal - mn) / (mx - mn)
    mod_sig = s + (1.0 - modulation)   # (1-modulation).t() on a 1D tensor is identity
    mod_sig = mod_sig * (mx - mn) + mn
    return mod_sig.T


if __name__ == "__main__":
    # Small deterministic setup.
    B, L = 4, 256
    data_axis = np.linspace(0.0, 1.0, L, dtype=np.float32)
    modulation_np = construct_modulation(data_axis, window_center=0.5,
                                         window_size=0.1, amplitude=0.5)
    modulation = jnp.asarray(modulation_np)

    key = jax.random.PRNGKey(0)
    signal = jax.random.normal(key, (B, L), dtype=jnp.float32)

    out = jax.block_until_ready(add_spike(signal, modulation))
    ref = add_spike_ref(signal, modulation)

    assert out.shape == (L, B), out.shape
    np.testing.assert_allclose(np.asarray(out), np.asarray(ref), rtol=1e-5, atol=2e-5)

    print("KERNEL_OK")
</pallas_src>

<mosaic_0001>
module attributes {stable_mosaic.version = 11 : i64} {
  func.func @_minmax_kernel(%arg0: i32, %arg1: i32, %arg2: memref<4x256xf32, #tpu.memory_space<vmem>>, %arg3: memref<1x1xf32, #tpu.memory_space<vmem>>, %arg4: memref<1x1xf32, #tpu.memory_space<vmem>>) attributes {dimension_semantics = [#tpu.dimension_semantics<arbitrary>, #tpu.dimension_semantics<arbitrary>], iteration_bounds = array<i64: 1, 1>, scalar_prefetch = 0 : i64, scratch_operands = 0 : i64, tpu.core_type = #tpu.core_type<tc>, window_params = [{transform_indices = @transform_0, window_bounds = array<i64: 4, 256>}, {pipeline_mode = #tpu.pipeline_mode<synchronous>, transform_indices = @transform_1, window_bounds = array<i64: 1, 1>}, {pipeline_mode = #tpu.pipeline_mode<synchronous>, transform_indices = @transform_2, window_bounds = array<i64: 1, 1>}]} {
    %c0_i32 = arith.constant 0 : i32
    %0 = arith.cmpi eq, %arg0, %c0_i32 : i32
    %c0_i32_0 = arith.constant 0 : i32
    %1 = arith.cmpi eq, %arg1, %c0_i32_0 : i32
    %2 = arith.andi %0, %1 : i1
    %3 = arith.extui %2 : i1 to i32
    %c0_i32_1 = arith.constant 0 : i32
    %4 = arith.cmpi ne, %3, %c0_i32_1 : i32
    scf.if %4 {
      %cst_16 = arith.constant 0x7F800000 : f32
      %39 = vector.broadcast %cst_16 : f32 to vector<1x1xf32>
      %c0_17 = arith.constant 0 : index
      %c0_18 = arith.constant 0 : index
      %40 = vector.load %arg3[%c0_17, %c0_18] : memref<1x1xf32, #tpu.memory_space<vmem>>, vector<1x1xf32>
      tpu.vector_store %arg3[%c0_17, %c0_18], %39 {strides = array<i32>} : memref<1x1xf32, #tpu.memory_space<vmem>>, vector<1x1xf32>,
      %cst_19 = arith.constant 0xFF800000 : f32
      %41 = vector.broadcast %cst_19 : f32 to vector<1x1xf32>
      %c0_20 = arith.constant 0 : index
      %c0_21 = arith.constant 0 : index
      %42 = vector.load %arg4[%c0_20, %c0_21] : memref<1x1xf32, #tpu.memory_space<vmem>>, vector<1x1xf32>
      tpu.vector_store %arg4[%c0_20, %c0_21], %41 {strides = array<i32>} : memref<1x1xf32, #tpu.memory_space<vmem>>, vector<1x1xf32>,
    } else {
    }
    %c0 = arith.constant 0 : index
    %c0_2 = arith.constant 0 : index
    %5 = vector.load %arg2[%c0, %c0_2] : memref<4x256xf32, #tpu.memory_space<vmem>>, vector<4x256xf32>
    %c4_i32 = arith.constant 4 : i32
    %6 = arith.muli %arg0, %c4_i32 : i32
    %7 = tpu.iota {dimensions = array<i32: 0>} : vector<4x256xi32>
    %8 = vector.broadcast %6 : i32 to vector<4x256xi32>
    %9 = arith.addi %8, %7 : vector<4x256xi32>
    %c256_i32 = arith.constant 256 : i32
    %10 = arith.muli %arg1, %c256_i32 : i32
    %11 = tpu.iota {dimensions = array<i32: 1>} : vector<4x256xi32>
    %12 = vector.broadcast %10 : i32 to vector<4x256xi32>
    %13 = arith.addi %12, %11 : vector<4x256xi32>
    %c4_i32_3 = arith.constant 4 : i32
    %14 = vector.broadcast %c4_i32_3 : i32 to vector<4x256xi32>
    %15 = arith.cmpi slt, %9, %14 : vector<4x256xi32>
    %c256_i32_4 = arith.constant 256 : i32
    %16 = vector.broadcast %c256_i32_4 : i32 to vector<4x256xi32>
    %17 = arith.cmpi slt, %13, %16 : vector<4x256xi32>
    %18 = arith.andi %15, %17 : vector<4x256xi1>
    %cst = arith.constant 0x7F800000 : f32
    %19 = vector.broadcast %cst : f32 to vector<4x256xf32>
    %20 = arith.select %18, %5, %19 : vector<4x256xi1>, vector<4x256xf32>
    %21 = vector.shape_cast %20 : vector<4x256xf32> to vector<1x4x256xf32>
    %cst_5 = arith.constant dense<0x7F800000> : vector<1xf32>
    %22 = vector.multi_reduction <minimumf>, %21, %cst_5 [1, 2] : vector<1x4x256xf32> to vector<1xf32>
    %23 = vector.shape_cast %22 : vector<1xf32> to vector<1x1x1xf32>
    %24 = vector.extract %23[0, 0, 0] : f32 from vector<1x1x1xf32>
    %25 = vector.broadcast %24 : f32 to vector<1x1xf32>
    %cst_6 = arith.constant 0xFF800000 : f32
    %26 = vector.broadcast %cst_6 : f32 to vector<4x256xf32>
    %27 = arith.select %18, %5, %26 : vector<4x256xi1>, vector<4x256xf32>
    %28 = vector.shape_cast %27 : vector<4x256xf32> to vector<1x4x256xf32>
    %cst_7 = arith.constant dense<0xFF800000> : vector<1xf32>
    %29 = vector.multi_reduction <maximumf>, %28, %cst_7 [1, 2] : vector<1x4x256xf32> to vector<1xf32>
    %30 = vector.shape_cast %29 : vector<1xf32> to vector<1x1x1xf32>
    %31 = vector.extract %30[0, 0, 0] : f32 from vector<1x1x1xf32>
    %32 = vector.broadcast %31 : f32 to vector<1x1xf32>
    %c0_8 = arith.constant 0 : index
    %c0_9 = arith.constant 0 : index
    %33 = vector.load %arg3[%c0_8, %c0_9] : memref<1x1xf32, #tpu.memory_space<vmem>>, vector<1x1xf32>
    %34 = arith.minimumf %33, %25 : vector<1x1xf32>
    %c0_10 = arith.constant 0 : index
    %c0_11 = arith.constant 0 : index
    %35 = vector.load %arg3[%c0_10, %c0_11] : memref<1x1xf32, #tpu.memory_space<vmem>>, vector<1x1xf32>
    tpu.vector_store %arg3[%c0_10, %c0_11], %34 {strides = array<i32>} : memref<1x1xf32, #tpu.memory_space<vmem>>, vector<1x1xf32>,
    %c0_12 = arith.constant 0 : index
    %c0_13 = arith.constant 0 : index
    %36 = vector.load %arg4[%c0_12, %c0_13] : memref<1x1xf32, #tpu.memory_space<vmem>>, vector<1x1xf32>
    %37 = arith.maximumf %36, %32 : vector<1x1xf32>
    %c0_14 = arith.constant 0 : index
    %c0_15 = arith.constant 0 : index
    %38 = vector.load %arg4[%c0_14, %c0_15] : memref<1x1xf32, #tpu.memory_space<vmem>>, vector<1x1xf32>
    tpu.vector_store %arg4[%c0_14, %c0_15], %37 {strides = array<i32>} : memref<1x1xf32, #tpu.memory_space<vmem>>, vector<1x1xf32>,
    return
  }
  func.func @transform_0(%arg0: i32, %arg1: i32) -> (i32, i32) {
    %c0_i32 = arith.constant 0 : i32
    return %arg0, %arg1 : i32, i32
  }
  func.func @transform_1(%arg0: i32, %arg1: i32) -> (i32, i32) {
    %c0_i32 = arith.constant 0 : i32
    %c0_i32_0 = arith.constant 0 : i32
    %c0_i32_1 = arith.constant 0 : i32
    return %c0_i32, %c0_i32_0 : i32, i32
  }
  func.func @transform_2(%arg0: i32, %arg1: i32) -> (i32, i32) {
    %c0_i32 = arith.constant 0 : i32
    %c0_i32_0 = arith.constant 0 : i32
    %c0_i32_1 = arith.constant 0 : i32
    return %c0_i32, %c0_i32_0 : i32, i32
  }
}

</mosaic_0001>

<bundles_post_ra>
// kernel: tpu_custom_call.1
= control target key start
LH: loop header
LB: loop body
LE: loop exit
PB: predicated region body
PF: predicated region fallthrough
CT: control target
= control target key end

     0   :  { %8 = vsyncpa [#allocation3], 0  ;;  %s230_s0 = inlined_call_operand.hbm [shape: f32[4,256], index: 0, kind: input, shape index: {}]   ;;  %s231_s1 = inlined_call_operand.hbm [shape: f32[1,1], index: 1, kind: output, shape index: {0}]   ;;  %s232_s2 = inlined_call_operand.hbm [shape: f32[1,1], index: 2, kind: output, shape index: {1}]  }
   0x1   :  { %9 = vsyncpa [#allocation4], 0 }
   0x2   :  { %10 = vsyncpa [#allocation7], 0  ;;  %s197_s9 = smov [#allocation2]  }
   0x3   :  { %s17_s10 = sshll.u32 %s197_s9, 4  ;;  %s18_s10 = int_to_ptr.vmem [resolvable:$true] %s17_s10 }
   0x4   :  { %s139_s11 = scalar_lea.vmem %s18_s10, 128  ;;  %p144_p1 = scmp.lt.s32.totalorder %s18_s10, %s18_s10 }
   0x5   :  { %p140_p0 = scmp.ne.s32.totalorder %s18_s10, %s139_s11  ;;  %p145_p2 = scmp.lt.s32.totalorder %s139_s11, %s139_s11 }
   0x7   :  { %p146_p3 = por %p145_p2, %p144_p1 }
   0x9   :  { %p147_p4 = pnand %p146_p3, %p140_p0 }
   0xb   :  { %150 = shalt.err (!%p147_p4)
}
   0xc   :  { %20 = dma.hbm_to_vmem [thread:$0]  %s230_s0, 128, %s18_s10, [#allocation3]  }
   0xd   :  { %191 = dma.done.wait [#allocation3], 128  }
   0xe   :  { %192 = vsyncadd [#allocation3], 4294967168  ;;  %vm30_vm0 = vcmask 0   ;;  %v35_v0 = vlaneseq  ;;  %v198_v1 = vmov inf   ;;  %v199_v2 = vmov -inf   ;;  %v33_v4 = vld [vmem:[#allocation2] sm:$0xff] }
   0xf   :  { %31 = vst.msk [vmem:[#allocation5] sm:$0x1] %vm30_vm0, %v198_v1  ;;  %32 = vst.msk [vmem:[#allocation6] sm:$0x1] %vm30_vm0, %v199_v2  ;;  %vm56_vm2 = vcmask 1043456   ;;  %v52_v5 = vcombine.high %v33_v4, %v33_v4  ;;  %s200_s0 = smov [#allocation5]  }
  0x10   :  { %v36_v3 = vshrl.u32 %v35_v0, 7  ;;  %s98_s14 = sshll.u32 %s200_s0, 4  ;;  %s201_s16 = smov [#allocation6]   ;;  %s99_s14 = int_to_ptr.vmem [resolvable:$true] %s98_s14 }
  0x11   :  { %s108_s17 = sshll.u32 %s201_s16, 4  ;;  %s151_s19 = scalar_lea.vmem %s99_s14, 16  ;;  %s109_s17 = int_to_ptr.vmem [resolvable:$true] %s108_s17 }
  0x12   :  { %vm46_vm1 = vcmp.lt.s32.totalorder %v36_v3, 4  ;;  %p152_p5 = scmp.ne.s32.totalorder %s99_s14, %s151_s19  ;;  %s155_s20 = scalar_lea.vmem %s99_s14, 32 }
  0x13   :  { %v54_v6 = vsel %vm46_vm1, %v33_v4, inf  ;;  %v70_v7 = vsel %vm46_vm1, %v33_v4, -inf  ;;  %v55_v9 = vsel %vm46_vm1, %v52_v5, inf  ;;  %v71_v10 = vsel %vm46_vm1, %v52_v5, -inf  ;;  %p156_p6 = scmp.lt.s32.totalorder %s99_s14, %s99_s14  ;;  %p157_p7 = scmp.lt.s32.totalorder %s155_s20, %s151_s19 }
  0x14   :  { %v57_v8 = vsel %vm56_vm2, %v54_v6, inf  ;;  %v58_v11 = vsel %vm56_vm2, %v55_v9, inf  ;;  %v72_v12 = vsel %vm56_vm2, %v70_v7, -inf  ;;  %v73_v13 = vsel %vm56_vm2, %v71_v10, -inf }
  0x15   :  { %v59_v14 = vmin.f32 %v57_v8, %v58_v11  ;;  %v74_v15 = vmax.f32 %v72_v12, %v73_v13  ;;  %p158_p8 = por %p157_p7, %p156_p6 }
  0x16   :  { %v85_v30 = vld [vmem:[#allocation5] sm:$0x1]  ;;  %v89_v33 = vld [vmem:[#allocation6] sm:$0x1] }
  0x17   :  { %60 = vmin.xlane.f32.xlu0 %v59_v14  ;;  %p159_p9 = pnand %p158_p8, %p152_p5 }
  0x1b   :  { %75 = vmax.xlane.f32.xlu0 %v74_v15 }
  0xa0   :  { %v61_v16 = vpop.xlane.xlu0 %60 }
  0xa1   :  { %v62_v17 = vrot.slane %v61_v16, 4 }
  0xa3   :  { %v63_v18 = vmin.f32 %v61_v16, %v62_v17 }
  0xa4   :  { %v76_v19 = vpop.xlane.xlu0 %75 }
  0xa5   :  { %v64_v20 = vrot.slane %v63_v18, 2  ;;  %v77_v21 = vrot.slane %v76_v19, 4 }
  0xa7   :  { %v78_v22 = vmax.f32 %v76_v19, %v77_v21  ;;  %v65_v23 = vmin.f32 %v63_v18, %v64_v20 }
  0xa9   :  { %v79_v24 = vrot.slane %v78_v22, 2  ;;  %v66_v25 = vrot.slane %v65_v23, 1 }
  0xab   :  { %v80_v26 = vmax.f32 %v78_v22, %v79_v24  ;;  %v67_v27 = vmin.f32 %v65_v23, %v66_v25 }
  0xad   :  { %121 = vpush %v67_v27  ;;  %v81_v28 = vrot.slane %v80_v26, 1 }
  0xaf   :  { %v82_v29 = vmax.f32 %v80_v26, %v81_v28 }
  0xb1   :  { %123 = vpush %v82_v29 }
  0xde   :  { %s122_s15 = spop %121 }
  0xdf   :  { %v69_v31 = vstv %s122_s15 }
  0xe0   :  { %v86_v32 = vmin.f32 %v85_v30, %v69_v31 }
  0xe2   :  { %88 = vst.msk [vmem:[#allocation5] sm:$0x1] %vm30_vm0, %v86_v32  ;;  %s124_s18 = spop %123 }
  0xe3   :  { %v84_v34 = vstv %s124_s18 }
  0xe4   :  { %162 = shalt.err (!%p159_p9)
}
  0xe5   :  { %101 = dma.vmem_to_hbm [thread:$0]  %s99_s14, 16, %s231_s1, [#allocation4]   ;;  %v90_v35 = vmax.f32 %v89_v33, %v84_v34 }
  0xe6   :  { %s171_s23 = scalar_lea.vmem %s109_s17, 16  ;;  %s175_s24 = scalar_lea.vmem %s109_s17, 32 }
  0xe7   :  { %91 = vst.msk [vmem:[#allocation6] sm:$0x1] %vm30_vm0, %v90_v35  ;;  %p172_p10 = scmp.ne.s32.totalorder %s109_s17, %s171_s23  ;;  %p176_p11 = scmp.lt.s32.totalorder %s109_s17, %s109_s17 }
  0xe8   :  { %p177_p12 = scmp.lt.s32.totalorder %s175_s24, %s171_s23 }
  0xea   :  { %p178_p13 = por %p177_p12, %p176_p11 }
  0xec   :  { %p179_p0 = pnand %p178_p13, %p172_p10 }
  0xee   :  { %182 = shalt.err (!%p179_p0)
}
  0xef   :  { %111 = dma.vmem_to_hbm [thread:$0]  %s109_s17, 16, %s232_s2, [#allocation7]  }
  0xf0   :  { %193 = dma.done.wait [#allocation4], 16  }
  0xf1   :  { %194 = vsyncadd [#allocation4], 4294967280 }
  0xf2   :  { %195 = dma.done.wait [#allocation7], 16  }
  0xf3   :  { %196 = vsyncadd [#allocation7], 4294967280 }
  0xf4   :  { %118 = vsyncpa [#allocation3], 1 }
  0xf5   :  { %119 = vsyncpa [#allocation4], 1 }
  0xf6   :  { %120 = vsyncpa [#allocation7], 1 }

</bundles_post_ra>
